<compile_context>
chip_gen: v5e
topology: v5e:2x2
jax: 0.10.0
libtpu: 0.0.40
codegen_flags: <defaults>
</compile_context>

<pallas_src>
import functools

import numpy as np
import jax
import jax.numpy as jnp
from jax import lax
from jax.experimental import pallas as pl
from jax.experimental.pallas import tpu as pltpu

_PALLAS_MIN_CH = 32  # route convs with fewer in/out channels to plain XLA


# ----------------------------------------------------------------------------
# Pallas kernel: fused 3x3 conv (scale-folded weights) + shift + ReLU
# ----------------------------------------------------------------------------
def _conv3x3_kernel(x0_ref, x1_ref, x2_ref, w_ref, s_ref, o_ref, *, relu):
    """One grid step = one (batch n, output row h, cout tile j).

    x{0,1,2}_ref : (1, 1, W+2, Cin) bf16   padded input rows h, h+1, h+2
    w_ref        : (9*Cin, TN)      bf16   BN-scale-folded weights, (kh,kw,ci) major
    s_ref        : (1, TN)          f32    folded bias/BN shift
    o_ref        : (1, 1, W, TN)    f32
    """
    W = o_ref.shape[2]
    cin = x0_ref.shape[3]
    rows = (x0_ref, x1_ref, x2_ref)
    acc = None
    for kh in range(3):
        # Load the full padded row once (offset-0, aligned), upcast to f32 so
        # the kw-shifted window slices are plain 32-bit sublane slices, then
        # downcast right before the MXU dot (values are already bf16-exact).
        xrow = rows[kh][0, 0, :, :].astype(jnp.float32)            # (W+2, Cin)
        for kw in range(3):
            xt = xrow[kw:kw + W, :].astype(jnp.bfloat16)           # (W, Cin)
            tap = kh * 3 + kw
            wt = w_ref[tap * cin:(tap + 1) * cin, :]               # (Cin, TN)
            d = jnp.dot(xt, wt, preferred_element_type=jnp.float32)
            acc = d if acc is None else acc + d
    y = acc + s_ref[:, :]
    if relu:
        y = jnp.maximum(y, 0.0)
    o_ref[0, 0, :, :] = y.astype(o_ref.dtype)


def conv3x3_bn_relu_pallas(x, wmat, shift, relu=True):
    """x: (N,H,W,Cin) f32, wmat: (9*Cin, Cout) bf16, shift: (Cout,) f32."""
    N, H, W, Cin = x.shape
    K9, Cout = wmat.shape
    assert K9 == 9 * Cin
    # Only HBM-side prep: halo pad + bf16 cast (one fused XLA pass).
    xp = jnp.pad(x.astype(jnp.bfloat16), ((0, 0), (1, 1), (1, 1), (0, 0)))
    s2 = shift.reshape(1, Cout).astype(jnp.float32)

    tn = Cout                      # full-Cout tile (Cout <= 512 on this path)
    grid = (N, H, Cout // tn)

    def x_map(kh):
        return lambda n, h, j, _kh=kh: (n, h + _kh, 0, 0)

    return pl.pallas_call(
        functools.partial(_conv3x3_kernel, relu=relu),
        out_shape=jax.ShapeDtypeStruct((N, H, W, Cout), jnp.float32),
        grid_spec=pltpu.PrefetchScalarGridSpec(
            num_scalar_prefetch=0,
            grid=grid,
            in_specs=[
                pl.BlockSpec((1, 1, W + 2, Cin), x_map(0)),
                pl.BlockSpec((1, 1, W + 2, Cin), x_map(1)),
                pl.BlockSpec((1, 1, W + 2, Cin), x_map(2)),
                pl.BlockSpec((9 * Cin, tn), lambda n, h, j: (0, j)),
                pl.BlockSpec((1, tn), lambda n, h, j: (0, j)),
            ],
            out_specs=pl.BlockSpec((1, 1, W, tn), lambda n, h, j: (n, h, 0, j)),
        ),
        compiler_params=pltpu.CompilerParams(
            dimension_semantics=("parallel", "parallel", "arbitrary")),
    )(xp, xp, xp, wmat, s2)


# ----------------------------------------------------------------------------
# XLA fallbacks for tiny-channel layers (per perf review) + glue ops
# ----------------------------------------------------------------------------
def conv3x3_bn_relu_xla(x, w, shift, relu=True):
    # TODO(synk): tiny-channel (<32) convs and the 1x1 outconv stay on XLA per
    # the performance review (padding 4..16 channels to 128 lanes is wasteful).
    y = lax.conv_general_dilated(
        x, w, window_strides=(1, 1), padding='SAME',
        dimension_numbers=('NHWC', 'HWIO', 'NHWC'))
    y = y + shift
    return jnp.maximum(y, 0.0) if relu else y


def conv1x1(x, w, b):
    return jnp.tensordot(x, w, axes=[[3], [0]]) + b


def maxpool2(x):
    N, H, W, C = x.shape
    return x.reshape(N, H // 2, 2, W // 2, 2, C).max(axis=(2, 4))


def upsample2x_bilinear_align_corners(x):
    # Matches nn.Upsample(scale_factor=2, mode='bilinear', align_corners=True)
    N, H, W, C = x.shape

    def coords(out_size, in_size):
        if in_size == 1:
            i0 = jnp.zeros((out_size,), jnp.int32)
            return i0, i0, jnp.zeros((out_size,), jnp.float32)
        src = jnp.arange(out_size, dtype=jnp.float32) * (in_size - 1) / (out_size - 1)
        i0 = jnp.floor(src).astype(jnp.int32)
        i1 = jnp.minimum(i0 + 1, in_size - 1)
        return i0, i1, src - i0.astype(jnp.float32)

    y0, y1, wy = coords(2 * H, H)
    x0i, x1i, wx = coords(2 * W, W)
    top, bot = x[:, y0, :, :], x[:, y1, :, :]
    rows = top * (1.0 - wy)[None, :, None, None] + bot * wy[None, :, None, None]
    left, right = rows[:, :, x0i, :], rows[:, :, x1i, :]
    return left * (1.0 - wx)[None, None, :, None] + right * wx[None, None, :, None]


# ----------------------------------------------------------------------------
# Parameter init (raw, PyTorch-style) + one-time fold/prepare outside jit
# ----------------------------------------------------------------------------
def _init_double_conv(key, cin, cout):
    k1, k2 = jax.random.split(key)

    def conv_w(k, ci, co):
        return jax.random.normal(k, (3, 3, ci, co), jnp.float32) * (0.1 / np.sqrt(9 * ci))

    p = {'w1': conv_w(k1, cin, cout), 'b1': jnp.zeros((cout,), jnp.float32),
         'w2': conv_w(k2, cout, cout), 'b2': jnp.zeros((cout,), jnp.float32)}
    for i in ('1', '2'):
        p['g' + i] = jnp.ones((cout,), jnp.float32)
        p['be' + i] = jnp.zeros((cout,), jnp.float32)
        p['m' + i] = jnp.zeros((cout,), jnp.float32)
        p['v' + i] = jnp.ones((cout,), jnp.float32)
    return p


def init_unet16(key, n_channels, n_classes):
    blocks = [
        ('inc', n_channels, 64), ('down1', 64, 128), ('down2', 128, 256),
        ('down3', 256, 512), ('down4', 512, 512),
        ('up1', 1024, 256), ('up2', 512, 128), ('up3', 256, 64), ('up4', 128, 32),
        ('up5', 64, 16), ('up6', 32, 8), ('up7', 16, 4), ('up8', 8, 4),
        ('up_s1', 64, 32), ('up_s2', 32, 16), ('up_s3', 16, 8), ('up_s4', 8, 4),
    ]
    keys = jax.random.split(key, len(blocks) + 1)
    params = {name: _init_double_conv(k, ci, co)
              for k, (name, ci, co) in zip(keys[:-1], blocks)}
    params['outc_w'] = jax.random.normal(keys[-1], (1, 1, 4, n_classes), jnp.float32) * 0.1
    params['outc_b'] = jnp.zeros((n_classes,), jnp.float32)
    return params


def _fold_conv_bn(w, b, gamma, beta, mean, var, eps=1e-5):
    s = gamma / jnp.sqrt(var + eps)                 # inference-mode BN fold
    return w * s[None, None, None, :], beta + (b - mean) * s


def prepare_params(raw):
    """One-time (outside jit): fold BN scale into weights, flatten to the
    Pallas matmul layout, cast matmul operands to bf16."""
    out = {}
    for name, p in raw.items():
        if name in ('outc_w', 'outc_b'):
            continue
        convs = []
        for i in ('1', '2'):
            wf, shift = _fold_conv_bn(p['w' + i], p['b' + i], p['g' + i],
                                      p['be' + i], p['m' + i], p['v' + i])
            cin, cout = wf.shape[2], wf.shape[3]
            if cin >= _PALLAS_MIN_CH and cout >= _PALLAS_MIN_CH:
                convs.append({'wmat': wf.reshape(9 * cin, cout).astype(jnp.bfloat16),
                              'shift': shift.astype(jnp.float32)})
            else:
                convs.append({'w': wf.astype(jnp.float32),
                              'shift': shift.astype(jnp.float32)})
        out[name] = convs
    out['outc_w'] = raw['outc_w'].reshape(raw['outc_w'].shape[2], raw['outc_w'].shape[3])
    out['outc_b'] = raw['outc_b']
    return out


# ----------------------------------------------------------------------------
# Forward pass
# ----------------------------------------------------------------------------
def _apply_conv(p, x):
    if 'wmat' in p:
        return conv3x3_bn_relu_pallas(x, p['wmat'], p['shift'])
    return conv3x3_bn_relu_xla(x, p['w'], p['shift'])


def apply_double_conv(p, x):
    return _apply_conv(p[1], _apply_conv(p[0], x))


def unet16_forward(params, x_nchw):
    x = jnp.transpose(x_nchw, (0, 2, 3, 1))          # NCHW -> NHWC

    def up(p, deep, skip):                            # cat([skip, upsample(deep)])
        d = upsample2x_bilinear_align_corners(deep)
        assert d.shape[1:3] == skip.shape[1:3]
        return apply_double_conv(p, jnp.concatenate([skip, d], axis=-1))

    def up_s(p, a):
        return apply_double_conv(p, upsample2x_bilinear_align_corners(a))

    x1 = apply_double_conv(params['inc'], x)
    x2 = apply_double_conv(params['down1'], maxpool2(x1))
    x3 = apply_double_conv(params['down2'], maxpool2(x2))
    x4 = apply_double_conv(params['down3'], maxpool2(x3))
    x5 = apply_double_conv(params['down4'], maxpool2(x4))

    x = up(params['up1'], x5, x4)
    x = up(params['up2'], x, x3)
    x = up(params['up3'], x, x2)
    x = up(params['up4'], x, x1)

    x0 = up_s(params['up_s1'], x1)
    x_1 = up_s(params['up_s2'], x0)
    x_2 = up_s(params['up_s3'], x_1)
    x_3 = up_s(params['up_s4'], x_2)

    x = up(params['up5'], x, x0)
    x = up(params['up6'], x, x_1)
    x = up(params['up7'], x, x_2)
    x = up(params['up8'], x, x_3)

    x = conv1x1(x, params['outc_w'], params['outc_b'])
    return jnp.transpose(x, (0, 3, 1, 2))             # NHWC -> NCHW


# ----------------------------------------------------------------------------
# Self-check for the Pallas conv (against XLA conv, bf16-rounded operands)
# ----------------------------------------------------------------------------
def _selfcheck_pallas_conv(key):
    kx, kw, ks = jax.random.split(key, 3)
    cin, cout = 64, 64
    x = jax.random.normal(kx, (2, 16, 16, cin), jnp.float32)
    w = jax.random.normal(kw, (3, 3, cin, cout), jnp.float32) * 0.05
    shift = jax.random.normal(ks, (cout,), jnp.float32) * 0.1
    wmat = w.reshape(9 * cin, cout).astype(jnp.bfloat16)
    y_pal = conv3x3_bn_relu_pallas(x, wmat, shift)
    x_r = x.astype(jnp.bfloat16).astype(jnp.float32)
    w_r = wmat.astype(jnp.float32).reshape(3, 3, cin, cout)
    y_ref = conv3x3_bn_relu_xla(x_r, w_r, shift)
    err = float(jnp.max(jnp.abs(y_pal - y_ref)))
    assert err < 5e-2, f"pallas conv mismatch, max abs err = {err}"


if __name__ == "__main__":
    key = jax.random.PRNGKey(0)
    n_channels, n_classes = 4, 2
    pkey, xkey, ckey = jax.random.split(key, 3)

    _selfcheck_pallas_conv(ckey)

    raw_params = init_unet16(pkey, n_channels, n_classes)
    params = prepare_params(raw_params)      # fold/flatten/bf16-cast once
    x = jax.random.normal(xkey, (2, n_channels, 16, 16), jnp.float32)  # NCHW

    fwd = jax.jit(unet16_forward)
    y = jax.block_until_ready(fwd(params, x))
    assert y.shape == (2, n_classes, 256, 256), y.shape
    assert bool(jnp.all(jnp.isfinite(y)))
    print("KERNEL_OK")
</pallas_src>

<mosaic_0001>
module attributes {stable_mosaic.version = 11 : i64} {
  func.func @_conv3x3_kernel(%arg0: i32, %arg1: i32, %arg2: i32, %arg3: memref<1x1x18x64xbf16, #tpu.memory_space<vmem>>, %arg4: memref<1x1x18x64xbf16, #tpu.memory_space<vmem>>, %arg5: memref<1x1x18x64xbf16, #tpu.memory_space<vmem>>, %arg6: memref<576x64xbf16, #tpu.memory_space<vmem>>, %arg7: memref<1x64xf32, #tpu.memory_space<vmem>>, %arg8: memref<1x1x16x64xf32, #tpu.memory_space<vmem>>) attributes {dimension_semantics = [#tpu.dimension_semantics<parallel>, #tpu.dimension_semantics<parallel>, #tpu.dimension_semantics<arbitrary>], iteration_bounds = array<i64: 2, 16, 1>, scalar_prefetch = 0 : i64, scratch_operands = 0 : i64, tpu.core_type = #tpu.core_type<tc>, window_params = [{transform_indices = @transform_0, window_bounds = array<i64: 1, 1, 18, 64>}, {transform_indices = @transform_1, window_bounds = array<i64: 1, 1, 18, 64>}, {transform_indices = @transform_2, window_bounds = array<i64: 1, 1, 18, 64>}, {transform_indices = @transform_3, window_bounds = array<i64: 576, 64>}, {transform_indices = @transform_4, window_bounds = array<i64: 1, 64>}, {transform_indices = @transform_5, window_bounds = array<i64: 1, 1, 16, 64>}]} {
    %c0 = arith.constant 0 : index
    %c0_0 = arith.constant 0 : index
    %c0_1 = arith.constant 0 : index
    %c0_2 = arith.constant 0 : index
    %0 = vector.load %arg3[%c0, %c0_0, %c0_1, %c0_2] : memref<1x1x18x64xbf16, #tpu.memory_space<vmem>>, vector<1x1x18x64xbf16>
    %1 = vector.shape_cast %0 : vector<1x1x18x64xbf16> to vector<18x64xbf16>
    %2 = arith.extf %1 : vector<18x64xbf16> to vector<18x64xf32>
    %3 = vector.extract_strided_slice %2 {offsets = [0, 0], sizes = [16, 64], strides = [1, 1]} : vector<18x64xf32> to vector<16x64xf32>
    %4 = arith.truncf %3 : vector<16x64xf32> to vector<16x64xbf16>
    %c0_3 = arith.constant 0 : index
    %c0_4 = arith.constant 0 : index
    %5 = vector.load %arg6[%c0_3, %c0_4] : memref<576x64xbf16, #tpu.memory_space<vmem>>, vector<64x64xbf16>
    %cst = arith.constant dense<0.000000e+00> : vector<16x64xf32>
    %6 = tpu.matmul %4, %5, %cst {dimension_numbers = #tpu.dot_dimension_numbers<[1], [0], [0], [1], [0, 0, 1, 1], [], []>} : vector<16x64xbf16>, vector<64x64xbf16>, vector<16x64xf32> -> vector<16x64xf32>
    %7 = vector.extract_strided_slice %2 {offsets = [1, 0], sizes = [16, 64], strides = [1, 1]} : vector<18x64xf32> to vector<16x64xf32>
    %8 = arith.truncf %7 : vector<16x64xf32> to vector<16x64xbf16>
    %c64 = arith.constant 64 : index
    %c0_5 = arith.constant 0 : index
    %9 = vector.load %arg6[%c64, %c0_5] : memref<576x64xbf16, #tpu.memory_space<vmem>>, vector<64x64xbf16>
    %cst_6 = arith.constant dense<0.000000e+00> : vector<16x64xf32>
    %10 = tpu.matmul %8, %9, %cst_6 {dimension_numbers = #tpu.dot_dimension_numbers<[1], [0], [0], [1], [0, 0, 1, 1], [], []>} : vector<16x64xbf16>, vector<64x64xbf16>, vector<16x64xf32> -> vector<16x64xf32>
    %11 = arith.addf %6, %10 : vector<16x64xf32>
    %12 = vector.extract_strided_slice %2 {offsets = [2, 0], sizes = [16, 64], strides = [1, 1]} : vector<18x64xf32> to vector<16x64xf32>
    %13 = arith.truncf %12 : vector<16x64xf32> to vector<16x64xbf16>
    %c128 = arith.constant 128 : index
    %c0_7 = arith.constant 0 : index
    %14 = vector.load %arg6[%c128, %c0_7] : memref<576x64xbf16, #tpu.memory_space<vmem>>, vector<64x64xbf16>
    %cst_8 = arith.constant dense<0.000000e+00> : vector<16x64xf32>
    %15 = tpu.matmul %13, %14, %cst_8 {dimension_numbers = #tpu.dot_dimension_numbers<[1], [0], [0], [1], [0, 0, 1, 1], [], []>} : vector<16x64xbf16>, vector<64x64xbf16>, vector<16x64xf32> -> vector<16x64xf32>
    %16 = arith.addf %11, %15 : vector<16x64xf32>
    %c0_9 = arith.constant 0 : index
    %c0_10 = arith.constant 0 : index
    %c0_11 = arith.constant 0 : index
    %c0_12 = arith.constant 0 : index
    %17 = vector.load %arg4[%c0_9, %c0_10, %c0_11, %c0_12] : memref<1x1x18x64xbf16, #tpu.memory_space<vmem>>, vector<1x1x18x64xbf16>
    %18 = vector.shape_cast %17 : vector<1x1x18x64xbf16> to vector<18x64xbf16>
    %19 = arith.extf %18 : vector<18x64xbf16> to vector<18x64xf32>
    %20 = vector.extract_strided_slice %19 {offsets = [0, 0], sizes = [16, 64], strides = [1, 1]} : vector<18x64xf32> to vector<16x64xf32>
    %21 = arith.truncf %20 : vector<16x64xf32> to vector<16x64xbf16>
    %c192 = arith.constant 192 : index
    %c0_13 = arith.constant 0 : index
    %22 = vector.load %arg6[%c192, %c0_13] : memref<576x64xbf16, #tpu.memory_space<vmem>>, vector<64x64xbf16>
    %cst_14 = arith.constant dense<0.000000e+00> : vector<16x64xf32>
    %23 = tpu.matmul %21, %22, %cst_14 {dimension_numbers = #tpu.dot_dimension_numbers<[1], [0], [0], [1], [0, 0, 1, 1], [], []>} : vector<16x64xbf16>, vector<64x64xbf16>, vector<16x64xf32> -> vector<16x64xf32>
    %24 = arith.addf %16, %23 : vector<16x64xf32>
    %25 = vector.extract_strided_slice %19 {offsets = [1, 0], sizes = [16, 64], strides = [1, 1]} : vector<18x64xf32> to vector<16x64xf32>
    %26 = arith.truncf %25 : vector<16x64xf32> to vector<16x64xbf16>
    %c256 = arith.constant 256 : index
    %c0_15 = arith.constant 0 : index
    %27 = vector.load %arg6[%c256, %c0_15] : memref<576x64xbf16, #tpu.memory_space<vmem>>, vector<64x64xbf16>
    %cst_16 = arith.constant dense<0.000000e+00> : vector<16x64xf32>
    %28 = tpu.matmul %26, %27, %cst_16 {dimension_numbers = #tpu.dot_dimension_numbers<[1], [0], [0], [1], [0, 0, 1, 1], [], []>} : vector<16x64xbf16>, vector<64x64xbf16>, vector<16x64xf32> -> vector<16x64xf32>
    %29 = arith.addf %24, %28 : vector<16x64xf32>
    %30 = vector.extract_strided_slice %19 {offsets = [2, 0], sizes = [16, 64], strides = [1, 1]} : vector<18x64xf32> to vector<16x64xf32>
    %31 = arith.truncf %30 : vector<16x64xf32> to vector<16x64xbf16>
    %c320 = arith.constant 320 : index
    %c0_17 = arith.constant 0 : index
    %32 = vector.load %arg6[%c320, %c0_17] : memref<576x64xbf16, #tpu.memory_space<vmem>>, vector<64x64xbf16>
    %cst_18 = arith.constant dense<0.000000e+00> : vector<16x64xf32>
    %33 = tpu.matmul %31, %32, %cst_18 {dimension_numbers = #tpu.dot_dimension_numbers<[1], [0], [0], [1], [0, 0, 1, 1], [], []>} : vector<16x64xbf16>, vector<64x64xbf16>, vector<16x64xf32> -> vector<16x64xf32>
    %34 = arith.addf %29, %33 : vector<16x64xf32>
    %c0_19 = arith.constant 0 : index
    %c0_20 = arith.constant 0 : index
    %c0_21 = arith.constant 0 : index
    %c0_22 = arith.constant 0 : index
    %35 = vector.load %arg5[%c0_19, %c0_20, %c0_21, %c0_22] : memref<1x1x18x64xbf16, #tpu.memory_space<vmem>>, vector<1x1x18x64xbf16>
    %36 = vector.shape_cast %35 : vector<1x1x18x64xbf16> to vector<18x64xbf16>
    %37 = arith.extf %36 : vector<18x64xbf16> to vector<18x64xf32>
    %38 = vector.extract_strided_slice %37 {offsets = [0, 0], sizes = [16, 64], strides = [1, 1]} : vector<18x64xf32> to vector<16x64xf32>
    %39 = arith.truncf %38 : vector<16x64xf32> to vector<16x64xbf16>
    %c384 = arith.constant 384 : index
    %c0_23 = arith.constant 0 : index
    %40 = vector.load %arg6[%c384, %c0_23] : memref<576x64xbf16, #tpu.memory_space<vmem>>, vector<64x64xbf16>
    %cst_24 = arith.constant dense<0.000000e+00> : vector<16x64xf32>
    %41 = tpu.matmul %39, %40, %cst_24 {dimension_numbers = #tpu.dot_dimension_numbers<[1], [0], [0], [1], [0, 0, 1, 1], [], []>} : vector<16x64xbf16>, vector<64x64xbf16>, vector<16x64xf32> -> vector<16x64xf32>
    %42 = arith.addf %34, %41 : vector<16x64xf32>
    %43 = vector.extract_strided_slice %37 {offsets = [1, 0], sizes = [16, 64], strides = [1, 1]} : vector<18x64xf32> to vector<16x64xf32>
    %44 = arith.truncf %43 : vector<16x64xf32> to vector<16x64xbf16>
    %c448 = arith.constant 448 : index
    %c0_25 = arith.constant 0 : index
    %45 = vector.load %arg6[%c448, %c0_25] : memref<576x64xbf16, #tpu.memory_space<vmem>>, vector<64x64xbf16>
    %cst_26 = arith.constant dense<0.000000e+00> : vector<16x64xf32>
    %46 = tpu.matmul %44, %45, %cst_26 {dimension_numbers = #tpu.dot_dimension_numbers<[1], [0], [0], [1], [0, 0, 1, 1], [], []>} : vector<16x64xbf16>, vector<64x64xbf16>, vector<16x64xf32> -> vector<16x64xf32>
    %47 = arith.addf %42, %46 : vector<16x64xf32>
    %48 = vector.extract_strided_slice %37 {offsets = [2, 0], sizes = [16, 64], strides = [1, 1]} : vector<18x64xf32> to vector<16x64xf32>
    %49 = arith.truncf %48 : vector<16x64xf32> to vector<16x64xbf16>
    %c512 = arith.constant 512 : index
    %c0_27 = arith.constant 0 : index
    %50 = vector.load %arg6[%c512, %c0_27] : memref<576x64xbf16, #tpu.memory_space<vmem>>, vector<64x64xbf16>
    %cst_28 = arith.constant dense<0.000000e+00> : vector<16x64xf32>
    %51 = tpu.matmul %49, %50, %cst_28 {dimension_numbers = #tpu.dot_dimension_numbers<[1], [0], [0], [1], [0, 0, 1, 1], [], []>} : vector<16x64xbf16>, vector<64x64xbf16>, vector<16x64xf32> -> vector<16x64xf32>
    %52 = arith.addf %47, %51 : vector<16x64xf32>
    %c0_29 = arith.constant 0 : index
    %c0_30 = arith.constant 0 : index
    %53 = vector.load %arg7[%c0_29, %c0_30] : memref<1x64xf32, #tpu.memory_space<vmem>>, vector<1x64xf32>
    %54 = vector.broadcast %53 : vector<1x64xf32> to vector<16x64xf32>
    %55 = arith.addf %52, %54 : vector<16x64xf32>
    %cst_31 = arith.constant 0.000000e+00 : f32
    %56 = vector.broadcast %cst_31 : f32 to vector<16x64xf32>
    %57 = arith.maximumf %55, %56 : vector<16x64xf32>
    %c0_32 = arith.constant 0 : index
    %c0_33 = arith.constant 0 : index
    %c0_34 = arith.constant 0 : index
    %c0_35 = arith.constant 0 : index
    %58 = vector.load %arg8[%c0_32, %c0_33, %c0_34, %c0_35] : memref<1x1x16x64xf32, #tpu.memory_space<vmem>>, vector<1x1x16x64xf32>
    %59 = vector.shape_cast %58 : vector<1x1x16x64xf32> to vector<16x64xf32>
    %60 = vector.shape_cast %57 : vector<16x64xf32> to vector<1x1x16x64xf32>
    tpu.vector_store %arg8[%c0_32, %c0_33, %c0_34, %c0_35], %60 {strides = array<i32>} : memref<1x1x16x64xf32, #tpu.memory_space<vmem>>, vector<1x1x16x64xf32>,
    return
  }
  func.func @transform_0(%arg0: i32, %arg1: i32, %arg2: i32) -> (i32, i32, i32, i32) {
    %c0_i32 = arith.constant 0 : i32
    %0 = arith.addi %arg1, %c0_i32 : i32
    %c0_i32_0 = arith.constant 0 : i32
    %c0_i32_1 = arith.constant 0 : i32
    %c0_i32_2 = arith.constant 0 : i32
    return %arg0, %0, %c0_i32_0, %c0_i32_1 : i32, i32, i32, i32
  }
  func.func @transform_1(%arg0: i32, %arg1: i32, %arg2: i32) -> (i32, i32, i32, i32) {
    %c1_i32 = arith.constant 1 : i32
    %0 = arith.addi %arg1, %c1_i32 : i32
    %c0_i32 = arith.constant 0 : i32
    %c0_i32_0 = arith.constant 0 : i32
    %c0_i32_1 = arith.constant 0 : i32
    return %arg0, %0, %c0_i32, %c0_i32_0 : i32, i32, i32, i32
  }
  func.func @transform_2(%arg0: i32, %arg1: i32, %arg2: i32) -> (i32, i32, i32, i32) {
    %c2_i32 = arith.constant 2 : i32
    %0 = arith.addi %arg1, %c2_i32 : i32
    %c0_i32 = arith.constant 0 : i32
    %c0_i32_0 = arith.constant 0 : i32
    %c0_i32_1 = arith.constant 0 : i32
    return %arg0, %0, %c0_i32, %c0_i32_0 : i32, i32, i32, i32
  }
  func.func @transform_3(%arg0: i32, %arg1: i32, %arg2: i32) -> (i32, i32) {
    %c0_i32 = arith.constant 0 : i32
    %c0_i32_0 = arith.constant 0 : i32
    return %c0_i32, %arg2 : i32, i32
  }
  func.func @transform_4(%arg0: i32, %arg1: i32, %arg2: i32) -> (i32, i32) {
    %c0_i32 = arith.constant 0 : i32
    %c0_i32_0 = arith.constant 0 : i32
    return %c0_i32, %arg2 : i32, i32
  }
  func.func @transform_5(%arg0: i32, %arg1: i32, %arg2: i32) -> (i32, i32, i32, i32) {
    %c0_i32 = arith.constant 0 : i32
    %c0_i32_0 = arith.constant 0 : i32
    return %arg0, %arg1, %c0_i32, %arg2 : i32, i32, i32, i32
  }
}

</mosaic_0001>

<bundles_post_ra>
// kernel: tpu_custom_call.1
= control target key start
LH: loop header
LB: loop body
LE: loop exit
PB: predicated region body
PF: predicated region fallthrough
CT: control target
= control target key end

     0   :  { %10 = vsyncpa [#allocation3], 0  ;;  %s1793_s0 = inlined_call_operand.vmem [shape: bf16[2,18,18,64], index: 0, kind: input, shape index: {}]   ;;  %s1794_s1 = inlined_call_operand.vmem [shape: bf16[2,18,18,64], index: 1, kind: input, shape index: {}]   ;;  %s1795_s2 = inlined_call_operand.vmem [shape: bf16[2,18,18,64], index: 2, kind: input, shape index: {}]   ;;  %s1796_s3 = inlined_call_operand.vmem [shape: bf16[576,64], index: 3, kind: input, shape index: {}]   ;;  %s1797_s4 = inlined_call_operand.vmem [shape: f32[1,64], index: 4, kind: input, shape index: {}]   ;;  %s1798_s5 = inlined_call_operand.hbm [shape: f32[2,16,16,64], index: 5, kind: output, shape index: {}]  }
   0x1   :  { %12 = vsyncpa [#allocation3 + $0x1], 0  ;;  %s1518_s18 = smov 0   ;;  %s1520_s19 = smov 0  }
   0x2   :  { %s1522_s20 = smov 0   ;;  %s1524_s21 = smov 0  }
   0x3   :  { %s1526_s22 = smov 0   ;;  %s1528_s23 = smov 0  }
   0x4   :  { %s1530_s24 = smov 0   ;;  %s1532_s25 = smov 0  }
   0x5 LB: > { %1803 = sst [smem:[#allocation5_spill]] %s1476_s23  ;;  %s1091_s26 = sadd.s32 4294967295, %s1484_s25   ;;  %s1484_s25 = sphi %s1532_s25, %s18_s25   ;;  %s1480_s24 = sphi %s1530_s24, %s1814_s24   ;;  %s1476_s23 = sphi %s1528_s23, %s1813_s23   ;;  %s1472_s22 = sphi %s1526_s22, %s1812_s22   ;;  %s1468_s21 = sphi %s1524_s21, %s1811_s21   ;;  %s1464_s20 = sphi %s1522_s20, %s1817_s20   ;;  %s1460_s19 = sphi %s1520_s19, %s1816_s19   ;;  %s1456_s18 = sphi %s1518_s18, %s1815_s18  }
   0x6   : > { %1804 = sst [smem:[#allocation6_spill]] %s1480_s24  ;;  %s1092_s27 = sadd.s32 4294967294, %s1484_s25  }
   0x7   : > { %s33_s28 = sadd.s32 1, %s1476_s23  ;;  %s37_s29 = sadd.s32 1, %s1480_s24 }
   0x8   : > { %p35_p0 = scmp.ge.s32.totalorder %s33_s28, 16  ;;  %p198_p1 = scmp.ne.s32.totalorder %s1464_s20, %s1460_s19 }
   0x9   : > { %p199_p2 = scmp.eq.s32.totalorder %s1091_s26, 31  ;;  %p204_p5 = scmp.ne.s32.totalorder %s1460_s19, %s1456_s18 }
   0xa   : > { %s1819_s28 = smov (%p35_p0, %s33_s28), 0  ;;  %s1821_s29 = smov (!%p35_p0, %s37_s29), %s1480_s24 }
   0xb   : > { %1805 = sst [smem:[#allocation7_spill]] %s1819_s28  ;;  %s182_s30 = ssub.s32 %s1476_s23, %s1819_s28 }
   0xc   : > { %p1569_p3 = por %p199_p2, %p198_p1  ;;  %p39_p4 = scmp.ge.s32.totalorder %s1821_s29, 2 }
   0xd   : > { %p205_p6 = scmp.eq.s32.totalorder %s1092_s27, 31  ;;  %p1097_p7 = scmp.ge.s32.totalorder %s1484_s25, 1 }
   0xe   : > { %s1823_s29 = smov (%p39_p4, %s1821_s29), 0  ;;  %p276_p9 = scmp.lt.s32.totalorder %s1484_s25, 33 }
   0xf   : > { %1807 = sst [smem:[#allocation8_spill]] %s1823_s29  ;;  %p1578_p8 = por %p205_p6, %p204_p5 }
  0x10   : > { %s181_s8 = ssub.s32 %s1480_s24, %s1823_s29  ;;  %s188_s9 = sadd.s32 1, %s1464_s20 }
  0x11   : > { %s183_s10 = sor.u32 %s182_s30, %s181_s8  ;;  %p277_p10 = pnand %p1097_p7, %p276_p9 }
  0x12   : > { %p186_p11 = scmp.eq.s32.totalorder %s183_s10, 0  ;;  %p335_p12 = scmp.lt.s32.totalorder (!%p277_p10), %s1472_s22, 1 }
  0x13   : > { %280 = sbr.rel (%p277_p10) target bundleno = 220 (0xdc), region = 40  ;;  %p337_p13 = scmp.lt.s32.totalorder (!%p277_p10), %s1468_s21, 17 }
  0x14   : > { %s1587_s11 = scalar_select %p186_p11, %s1464_s20, %s188_s9  }
  0x15   : > { %s344_s27 = sadd.s32 (!%p277_p10), 1, %s1468_s21  ;;  %s332_s15 = sand.u32 (!%p277_p10), 1, %s1460_s19  }
  0x16   : > { %p1626_p0 = scmp.lt.s32.totalorder (!%p277_p10), %s344_s27, 17 }
  0x18   : > { %v1285_v0 = vld [vmem:[%s1796_s3 + $0x58] sm:$0xff]  ;;  %v1284_v4 = vld [vmem:[%s1796_s3 + $0x50] sm:$0xff]  ;;  %s336_s12 = scalar_select %p335_p12, %s1472_s22, 1  ;;  %v1283_v8 = vld [vmem:[%s1796_s3 + $0x48] sm:$0xff]  ;;  %vm503_vm0 = vcmask 1046528   ;;  %vm435_vm1 = vcmask 523264  }
  0x19   : > { %v1281_v1 = vld [vmem:[%s1796_s3 + $0x38] sm:$0xff]  ;;  %538 = vmatpush.bf16.msra.mxu2 %v1285_v0  ;;  %v1280_v5 = vld [vmem:[%s1796_s3 + $0x30] sm:$0xff]  ;;  %s338_s17 = scalar_select %p337_p13, %s1468_s21, 17  ;;  %v1279_v9 = vld [vmem:[%s1796_s3 + $0x28] sm:$0xff]  ;;  %vm398_vm2 = vsmask.f32 7424 }
  0x1a   : > { %v1277_v2 = vld [vmem:[%s1796_s3 + $0x18] sm:$0xff]  ;;  %443 = vmatpush.bf16.msra.mxu0 %v1281_v1  ;;  %v1276_v6 = vld [vmem:[%s1796_s3 + $0x10] sm:$0xff]  ;;  %s1617_s26 = smul.u32 54, %s336_s12  ;;  %s355_s12 = sadd.s32 2, %s1468_s21  ;;  %v1275_v10 = vld [vmem:[%s1796_s3 + $0x8] sm:$0xff] }
  0x1b   : > { %v1290_v3 = vld [vmem:[%s1796_s3 + $0x78] sm:$0xff]  ;;  %483 = vmatpush.bf16.msra.mxu1 %v1277_v2  ;;  %v1289_v7 = vld [vmem:[%s1796_s3 + $0x70] sm:$0xff]  ;;  %s1312_s30 = smul.u32 3, %s338_s17  ;;  %v1288_v11 = vld [vmem:[%s1796_s3 + $0x68] sm:$0xff]  ;;  %p1638_p1 = scmp.lt.s32.totalorder %s355_s12, 17 }
  0x1c   : > { %596 = vmatpush.bf16.msra.mxu3 %v1290_v3  ;;  %v1282_v12 = vld [vmem:[%s1796_s3 + $0x40] sm:$0xff]  ;;  %s1825_s27 = smov (!%p1626_p0, %s344_s27), 17  ;;  %v1294_v21 = vld [vmem:[%s1796_s3 + $0x98] sm:$0xff]  ;;  %v1293_v31 = vld [vmem:[%s1796_s3 + $0x90] sm:$0xff] }
  0x1d   : > { %539 = vmatpush.bf16.msra.mxu2 %v1284_v4  ;;  %s341_s8 = sadd.s32 %s1617_s26, %s1312_s30  ;;  %v1278_v13 = vld [vmem:[%s1796_s3 + $0x20] sm:$0xff]  ;;  %s1827_s12 = smov (!%p1638_p1, %s355_s12), 17  ;;  %v1303_v22 = vld [vmem:[%s1796_s3 + $0xd8] sm:$0xff]  ;;  %v1302_v32 = vld [vmem:[%s1796_s3 + $0xd0] sm:$0xff] }
  0x1e   : > { %444 = vmatpush.bf16.msra.mxu0 %v1280_v5  ;;  %s1099_s9 = sshll.u32 %s341_s8, 2  ;;  %v1274_v16 = vld [vmem:[%s1796_s3] sm:$0xff]  ;;  %s1314_s23 = smul.u32 3, %s1825_s27  ;;  %v1307_v25 = vld [vmem:[%s1796_s3 + $0xf8] sm:$0xff]  ;;  %v1306_v36 = vld [vmem:[%s1796_s3 + $0xf0] sm:$0xff] }
  0x1f   : > { %484 = vmatpush.bf16.msra.mxu1 %v1276_v6  ;;  %s343_s14 = scalar_lea.vmem %s1793_s0, %s1099_s9  ;;  %v1287_v17 = vld [vmem:[%s1796_s3 + $0x60] sm:$0xff]  ;;  %v1298_v26 = vld [vmem:[%s1796_s3 + $0xb8] sm:$0xff]  ;;  %s1315_s27 = smul.u32 3, %s1827_s12  ;;  %v1297_v38 = vld [vmem:[%s1796_s3 + $0xb0] sm:$0xff] }
  0x20   : > { %597 = vmatpush.bf16.msra.mxu3 %v1289_v7  ;;  %v1273_v14 = vld [vmem:[%s343_s14] sm:$0xff]  ;;  %v376_v15 = vld [vmem:[%s343_s14 + $0x8] sm:$0x1]  ;;  %s351_s30 = sadd.s32 %s1314_s23, %s1617_s26  ;;  %v1311_v62 = vld [vmem:[%s1796_s3 + $0x118] sm:$0xff]  ;;  %s915_s12 = scalar_lea.sflag [#allocation3], %s332_s15 }
  0x21   : > { %540 = vmatpush.bf16.msra.mxu2 %v1283_v8  ;;  %v379_v18 = vunpack.c.l.bf16 %v376_v15  ;;  %v400_v19 = vshrl.u32 %v1273_v14, 16  ;;  %v402_v20 = vshll.u32 %v1273_v14, 16  ;;  %v504_v24 = vrot.slane %v1273_v14, 1  ;;  %s1100_s17 = sshll.u32 %s351_s30, 2  ;;  %s362_s28 = sadd.s32 %s1315_s27, %s1617_s26  ;;  %v1301_v44 = vld [vmem:[%s1796_s3 + $0xc8] sm:$0xff]  ;;  %v1300_v52 = vld [vmem:[%s1796_s3 + $0xc0] sm:$0xff] }
  0x22   : > { %445 = vmatpush.bf16.msra.mxu0 %v1279_v9  ;;  %s353_s13 = scalar_lea.vmem %s1794_s1, %s1100_s17  ;;  %s1101_s14 = sshll.u32 %s362_s28, 2  ;;  %v1292_v46 = vld [vmem:[%s1796_s3 + $0x88] sm:$0xff]  ;;  %v1291_v56 = vld [vmem:[%s1796_s3 + $0x80] sm:$0xff]  ;;  %v1310_v6 = vld [vmem:[%s1796_s3 + $0x110] sm:$0xff] }
  0x23   : > { %485 = vmatpush.bf16.msra.mxu1 %v1275_v10  ;;  %v389_v23 = vpack.c.bf16 %v379_v18, %v379_v18  ;;  %v404_v27 = vrot.slane %v402_v20, 1  ;;  %v1286_v35 = vld [vmem:[%s353_s13] sm:$0xff]  ;;  %s364_s27 = scalar_lea.vmem %s1795_s2, %s1101_s14  ;;  %v552_v37 = vld [vmem:[%s353_s13 + $0x8] sm:$0x1]  ;;  %s1268_s14 = sshll.u32 %s1468_s21, 1 }
  0x24   : > { %598 = vmatpush.bf16.msra.mxu3 %v1288_v11  ;;  %v1299_v39 = vld [vmem:[%s364_s27] sm:$0xff]  ;;  %v555_v40 = vunpack.c.l.bf16 %v552_v37  ;;  %v729_v41 = vld [vmem:[%s364_s27 + $0x8] sm:$0x1]  ;;  %v619_v49 = vshll.u32 %v1286_v35, 16  ;;  %v617_v58 = vshrl.u32 %v1286_v35, 16  ;;  %v681_v63 = vrot.slane %v1286_v35, 1 }
  0x25   : > { %541 = vmatpush.bf16.msra.mxu2 %v1282_v12  ;;  %v505_v28 = vrot.slane %v389_v23, 1  ;;  %v407_v29 = vshll.u32 %v389_v23, 16  ;;  %v405_v30 = vor.u32 %v404_v27, %v400_v19  ;;  %v732_v43 = vunpack.c.l.bf16 %v729_v41  ;;  %v1305_v47 = vld [vmem:[%s1796_s3 + $0xe8] sm:$0xff]  ;;  %v1304_v57 = vld [vmem:[%s1796_s3 + $0xe0] sm:$0xff]  ;;  %s1269_s26 = sshll.u32 %s1472_s22, 5  ;;  %s1098_s30 = sshll.u32 %s332_s15, 4 }
  0x26   : > { %446 = vmatpush.bf16.msra.mxu0 %v1278_v13  ;;  %v796_v45 = vshll.u32 %v1299_v39, 16  ;;  %v608_v48 = vpack.c.bf16 %v555_v40, %v555_v40  ;;  %v1296_v51 = vld [vmem:[%s1796_s3 + $0xa8] sm:$0xff]  ;;  %v794_v53 = vshrl.u32 %v1299_v39, 16  ;;  %v621_v59 = vrot.slane %v619_v49, 1  ;;  %v1295_v61 = vld [vmem:[%s1796_s3 + $0xa0] sm:$0xff]  ;;  %s927_s27 = sadd.s32 %s1269_s26, %s1268_s14  ;;  %s334_s8 = scalar_lea.vmem [#allocation2], %s1098_s30 }
  0x27   : > { %486 = vmatpush.bf16.msra.mxu1 %v1274_v16  ;;  %v506_v33 = vsel %vm503_vm0, %v504_v24, %v505_v28  ;;  %v409_v34 = vrot.slane %v407_v29, 1  ;;  %v785_v50 = vpack.c.bf16 %v732_v43, %v732_v43  ;;  %v1309_v9 = vld [vmem:[%s1796_s3 + $0x108] sm:$0xff]  ;;  %v1308_v10 = vld [vmem:[%s1796_s3 + $0x100] sm:$0xff]  ;;  %v858_v11 = vrot.slane %v1299_v39, 1  ;;  %s1270_s17 = sshll.u32 %s927_s27, 3  ;;  %s930_s24 = sshll.u32 %s334_s8, 4  ;;  %s931_s24 = int_to_ptr.vmem [resolvable:$true] %s930_s24 }
  0x28   : > { %599 = vmatpush.bf16.msra.mxu3 %v1287_v17  ;;  %1156 = vmatmul.msk.bf16.vlgmr.msra.gmra.mxu2 %vm435_vm1, %v506_v33  ;;  %v798_v54 = vrot.slane %v796_v45, 1  ;;  %v624_v60 = vshll.u32 %v608_v48, 16  ;;  %v682_v0 = vrot.slane %v608_v48, 1  ;;  %v622_v3 = vor.u32 %v621_v59, %v617_v58  ;;  %v1389_v40 = vld [vmem:[%s1797_s4] ss:$0 sm:$0xff]  ;;  %s929_s22 = scalar_lea.hbm %s1798_s5, %s1270_s17  ;;  %s1410_s26 = scalar_lea.hbm %s1798_s5, 512 }
  0x29   : > { %773 = vmatpush.bf16.msrb.mxu2 %v1303_v22  ;;  %v410_v42 = vsel %vm398_vm2, %v405_v30, %v409_v34  ;;  %v801_v55 = vshll.u32 %v785_v50, 16  ;;  %v859_v12 = vrot.slane %v785_v50, 1  ;;  %s932_s13 = sshll.u32 %s929_s22, 4  ;;  %s933_s13 = int_to_ptr.hbm [resolvable:$true] %s932_s13 }
  0x2a   : > { %659 = vmatpush.bf16.msrb.mxu0 %v1294_v21  ;;  %1139 = vmatmul.msk.bf16.vlgmr.msra.gmra.mxu1 %vm435_vm1, %v1273_v14  ;;  %v799_v1 = vor.u32 %v798_v54, %v794_v53  ;;  %v626_v4 = vrot.slane %v624_v60, 1  ;;  %v683_v5 = vsel %vm503_vm0, %v681_v63, %v682_v0  ;;  %s1404_s9 = sshra.s32 %s933_s13, 4  ;;  %s1405_s9 = int_to_ptr.hbm [resolvable:$true] %s1404_s9 }
  0x2b   : > { %715 = vmatpush.bf16.msrb.mxu1 %v1298_v26  ;;  %1177 = vmatmul.msk.bf16.vlgmr.msra.gmra.mxu3 %vm435_vm1, %v1286_v35  ;;  %v803_v2 = vrot.slane %v801_v55, 1  ;;  %v860_v13 = vsel %vm503_vm0, %v858_v11, %v859_v12  ;;  %s1406_s23 = scalar_lea.hbm %s1405_s9, 16  ;;  %p1411_p6 = scmp.lt.s32.totalorder %s1405_s9, %s1798_s5 }
  0x2c   : > { %836 = vmatpush.bf16.msrb.mxu3 %v1307_v25  ;;  %1122 = vmatmul.msk.bf16.vlgmr.msra.gmra.mxu0 %vm435_vm1, %v410_v42  ;;  %v627_v8 = vsel %vm398_vm2, %v622_v3, %v626_v4  ;;  %p1407_p2 = scmp.ne.s32.totalorder %s1405_s9, %s1406_s23  ;;  %p1412_p7 = scmp.lt.s32.totalorder %s1410_s26, %s1406_s23 }
  0x2d   : > { %774 = vmatpush.bf16.msrb.mxu2 %v1302_v32  ;;  %v804_v7 = vsel %vm398_vm2, %v799_v1, %v803_v2 }
  0x2e   : > { %660 = vmatpush.bf16.msrb.mxu0 %v1293_v31  ;;  %p1408_p4 = pnand %p1407_p2, %p1569_p3  ;;  %p1413_p9 = por %p1412_p7, %p1411_p6 }
  0x2f   : > { %716 = vmatpush.bf16.msrb.mxu1 %v1297_v38 }
  0x30   : > { %837 = vmatpush.bf16.msrb.mxu3 %v1306_v36  ;;  %p1409_p5 = pneg %p1408_p4 }
  0x31   : > { %775 = vmatpush.bf16.msrb.mxu2 %v1301_v44 }
  0x32   : > { %661 = vmatpush.bf16.msrb.mxu0 %v1292_v46  ;;  %p1414_p10 = pnand %p1413_p9, %p1409_p5 }
  0x33   : > { %717 = vmatpush.bf16.msrb.mxu1 %v1296_v51 }
  0x34   : > { %838 = vmatpush.bf16.msrb.mxu3 %v1305_v47 }
  0x35   : > { %776 = vmatpush.bf16.msrb.mxu2 %v1300_v52 }
  0x36   : > { %662 = vmatpush.bf16.msrb.mxu0 %v1291_v56 }
  0x37   : > { %718 = vmatpush.bf16.msrb.mxu1 %v1295_v61 }
  0x38   : > { %839 = vmatpush.bf16.msrb.mxu3 %v1304_v57  ;;  %1232 = vmatmul.msk.bf16.vlgmr.msrb.gmra.mxu2 %vm435_vm1, %v1299_v39 }
  0x3a   : > { %892 = vmatpush.bf16.msra.mxu0 %v1311_v62  ;;  %1211 = vmatmul.msk.bf16.vlgmr.msrb.gmra.mxu1 %vm435_vm1, %v683_v5 }
  0x3b   : > { %1249 = vmatmul.msk.bf16.vlgmr.msrb.gmra.mxu3 %vm435_vm1, %v804_v7 }
  0x3c   : > { %1194 = vmatmul.msk.bf16.vlgmr.msrb.gmra.mxu0 %vm435_vm1, %v627_v8 }
  0x3e   : > { %893 = vmatpush.bf16.msra.mxu0 %v1310_v6 }
  0x42   : > { %894 = vmatpush.bf16.msra.mxu0 %v1309_v9 }
  0x46   : > { %895 = vmatpush.bf16.msra.mxu0 %v1308_v10 }
  0x4c   : > { %1266 = vmatmul.msk.bf16.vlgmr.msra.gmra.mxu0 %vm435_vm1, %v860_v13 }
  0xa7   : > { %v488_v15 = vpop.f32.mrf.mxu1 }
  0xa9   : > { %v448_v14 = vpop.f32.mrf.mxu0 }
  0xaa   : > { %v489_v20 = vadd.f32 %v488_v15, %v448_v14 }
  0xab   : > { %v543_v16 = vpop.f32.mrf.mxu2 }
  0xac   : > { %v548_v22 = vadd.f32 %v543_v16, %v489_v20 }
  0xae   : > { %v601_v17 = vpop.f32.mrf.mxu3 }
  0xaf   : > { %v490_v19 = vpop.f32.mrf.mxu1  ;;  %v606_v25 = vadd.f32 %v601_v17, %v548_v22 }
  0xb1   : > { %v450_v18 = vpop.f32.mrf.mxu0 }
  0xb2   : > { %v491_v27 = vadd.f32 %v490_v19, %v450_v18 }
  0xb3   : > { %v545_v21 = vpop.f32.mrf.mxu2 }
  0xb4   : > { %v549_v29 = vadd.f32 %v545_v21, %v491_v27 }
  0xb6   : > { %v603_v23 = vpop.f32.mrf.mxu3 }
  0xb7   : > { %v720_v26 = vpop.f32.mrf.mxu1  ;;  %v607_v33 = vadd.f32 %v603_v23, %v549_v29 }
  0xb9   : > { %v664_v24 = vpop.f32.mrf.mxu0 }
  0xba   : > { %v669_v28 = vadd.f32 %v664_v24, %v606_v25 }
  0xbb   : > { %v778_v30 = vpop.f32.mrf.mxu2 }
  0xbc   : > { %v725_v31 = vadd.f32 %v720_v26, %v669_v28 }
  0xbe   : > { %v841_v34 = vpop.f32.mrf.mxu3  ;;  %v783_v35 = vadd.f32 %v778_v30, %v725_v31 }
  0xbf   : > { %v722_v37 = vpop.f32.mrf.mxu1 }
  0xc0   : > { %v846_v38 = vadd.f32 %v841_v34, %v783_v35 }
  0xc1   : > { %v666_v32 = vpop.f32.mrf.mxu0 }
  0xc2   : > { %v670_v36 = vadd.f32 %v666_v32, %v607_v33 }
  0xc3   : > { %v780_v41 = vpop.f32.mrf.mxu2 }
  0xc4   : > { %v726_v39 = vadd.f32 %v722_v37, %v670_v36 }
  0xc6   : > { %v784_v44 = vadd.f32 %v780_v41, %v726_v39  ;;  %v843_v46 = vpop.f32.mrf.mxu3 }
  0xc8   : > { %v847_v48 = vadd.f32 %v843_v46, %v784_v44 }
  0xc9   : > { %v897_v42 = vpop.f32.mrf.mxu0 }
  0xca   : > { %v902_v43 = vadd.f32 %v897_v42, %v846_v38 }
  0xcc   : > { %v908_v45 = vadd.f32 %v1389_v40, %v902_v43 }
  0xce   : > { %v910_v47 = vmax.f32 %v908_v45, 0.0 }
  0xd0   : > { %912 = vst.msk [vmem:[%s334_s8] sm:$0xff] %vm435_vm1, %v910_v47 }
  0xd1   : > { %v899_v49 = vpop.f32.mrf.mxu0 }
  0xd2   : > { %v903_v50 = vadd.f32 %v899_v49, %v847_v48 }
  0xd4   : > { %v909_v51 = vadd.f32 %v1389_v40, %v903_v50 }
  0xd6   : > { %v911_v52 = vmax.f32 %v909_v51, 0.0 }
  0xd8   : > { %913 = vst.msk [vmem:[%s334_s8 + $0x8] sm:$0xff] %vm435_vm1, %v911_v52 }
  0xd9   : > { %1417 = shalt.err (!%p1414_p10)
}
  0xda   : > { %s1486_s15 = smov 128   ;;  %s1487_s27 = smov 8  }
  0xdb   : > { %1316 = dma.vmem_to_hbm [thread:$0]  (%p1569_p3), %s931_s24, 256, %s933_s13, %s915_s12, %s1486_s15, %s1486_s15, %s1487_s27  }
  0xdc PF: > { %p1322_p11 = scmp.ge.s32.totalorder %s1484_s25, 2  ;;  %s947_s30 = sand.u32 1, %s1456_s18  }
  0xdd   : > { %s948_s17 = scalar_lea.sflag [#allocation3], %s947_s30 }
  0xde   : > { %p1319_p12 = pnand %p1322_p11, %p1578_p8 }
  0xe0   : > { %p1320_p13 = pneg %p1319_p12 }
  0xe2   : > { %1451 = dma.done.wait (%p1320_p13), %s948_s17, 256  }
  0xe3   : > { %1453 = vsyncadd (%p1320_p13), %s948_s17, 4294967040  ;;  %s18_s25 = sadd.s32 1, %s1484_s25   ;;  %s1811_s21 = sld [smem:[#allocation5_spill]] }
  0xe4   : > { %p15_p0 = scmp.ge.s32.totalorder %s18_s25, 34   ;;  %s1812_s22 = sld [smem:[#allocation6_spill]] }
  0xe5   : > { %s1813_s23 = sld [smem:[#allocation7_spill]]  ;;  %s1815_s18 = smov %s1460_s19 }
  0xe6   : > { %s1814_s24 = sld [smem:[#allocation8_spill]]  ;;  %s1816_s19 = smov %s1464_s20 }
  0xe7   : > { %s1817_s20 = smov %s1587_s11  ;;  %17 = sbr.rel (!%p15_p0) target bundleno = 5 (0x5), region = 87 }
  0xec   :  { %954 = vsyncpa [#allocation3], 1 }
  0xed   :  { %956 = vsyncpa [#allocation3 + $0x1], 1 }

</bundles_post_ra>
